<compile_context>
chip_gen: v6e
topology: v6e:2x2x1
jax: 0.10.0
libtpu: 0.0.40
codegen_flags: <defaults>
</compile_context>

<pallas_src>
import math

import jax
import jax.numpy as jnp
import numpy as np
from jax import lax
from jax.experimental import pallas as pl
from jax.experimental.pallas import tpu as pltpu


def _att_select_kernel(x_ref, wfc_ref, bfc_ref, wq_ref, bq_ref, out_ref):
    """Fused att_select forward for one block of BB batch elements.

    x_ref   : (BB, 2N, D)  both bags stacked along the instance axis
    wfc_ref : (D, C)       selectmax.fc weight, transposed to (in, out)
    bfc_ref : (1, C)
    wq_ref  : (D, D)       q[2] linear weight, transposed to (in, out)
    bq_ref  : (1, D)
    out_ref : (BB, 4*C*D + 4*ATT_W)  single lane-dense packed slab:
              [ xo rows 0..2C-1 | h rows 0..2C-1 | 4 zero-padded attention rows ]
    """
    x_all = x_ref[...]                    # (BB, 2N, D)
    wfc = wfc_ref[...]                    # (D, C)
    bfc = bfc_ref[...]                    # (1, C)
    wq = wq_ref[...]                      # (D, D)
    bq = bq_ref[...]                      # (1, D)

    BB, NN, D = x_all.shape
    C = wfc.shape[1]
    K = 2 * C                             # stacked query rows: [0,C)=bag1, [C,2C)=bag2
    N = NN // 2
    inv_sqrt_d = 1.0 / math.sqrt(D)

    # ---- fc scoring: ONE flattened matmul over both bags and all batches ----
    scores_flat = jnp.dot(x_all.reshape(BB * NN, D), wfc,
                          preferred_element_type=jnp.float32) + bfc       # (BB*NN, C)
    # classes on sublanes, instances on lanes for the argmax stage
    scores = jnp.swapaxes(scores_flat.reshape(BB, NN, C), 1, 2)           # (BB, C, NN)

    # ---- per-bag first-max argmax -> one-hot selection rows (exact gather) ----
    iota_n = lax.broadcasted_iota(jnp.int32, (BB, C, NN), 2)
    s1, s2 = scores[:, :, :N], scores[:, :, N:]
    i1, i2 = iota_n[:, :, :N], iota_n[:, :, N:]
    idx1 = jnp.min(jnp.where(s1 == jnp.max(s1, axis=-1, keepdims=True), i1, NN),
                   axis=-1, keepdims=True)                                # in [0, N)
    idx2 = jnp.min(jnp.where(s2 == jnp.max(s2, axis=-1, keepdims=True), i2, NN),
                   axis=-1, keepdims=True)                                # in [N, 2N)
    onehot = jnp.concatenate([(iota_n == idx1).astype(jnp.float32),
                              (iota_n == idx2).astype(jnp.float32)],
                             axis=1)                                      # (BB, 2C, NN)

    # gather the winning instance rows: h rows [0,C) = h1, [C,2C) = h2
    h = jnp.einsum('bkn,bnd->bkd', onehot, x_all,
                   preferred_element_type=jnp.float32)                    # (BB, 2C, D)

    # ---- q = Linear(Tanh(h)), one flattened matmul for both bags ----
    q = (jnp.dot(jnp.tanh(h).reshape(BB * K, D), wq,
                 preferred_element_type=jnp.float32) + bq).reshape(BB, K, D)

    # ---- attention over the FULL 2N instance axis, all 2C query rows at once ----
    s = jnp.einsum('bkd,bnd->bkn', q, x_all,
                   preferred_element_type=jnp.float32) * inv_sqrt_d       # (BB, 2C, 2N)
    e = jnp.exp(s - jnp.max(s, axis=-1, keepdims=True))
    a = e * pl.reciprocal(jnp.sum(e, axis=-1, keepdims=True))             # softmax rows

    xo = jnp.einsum('bkn,bnd->bkd', a, x_all,
                    preferred_element_type=jnp.float32)                   # (BB, 2C, D)
    xo = 0.9 * xo + 0.1 * q

    # ---- pack everything into ONE lane-dense output slab ----
    att_w = (out_ref.shape[1] - 2 * K * D) // 4       # padded attention row width (128)
    pad_w = att_w - NN
    row0 = a[:, 0, :]                                 # ATT1 source (bag-1 branch, class 0)
    rowc = a[:, C, :]                                 # ATT2 source (bag-2 branch, class 0)
    sum1 = jnp.sum(a[:, 1:C, :], axis=1)              # bag-1 branch, classes 1..C-1
    sum2 = jnp.sum(a[:, C + 1:, :], axis=1)           # bag-2 branch, classes 1..C-1
    att_rows = [row0, rowc, sum1, sum2]
    if pad_w:
        zpad = jnp.zeros((BB, pad_w), jnp.float32)
        att_pieces = []
        for r in att_rows:
            att_pieces += [r, zpad]
    else:
        att_pieces = att_rows

    pieces = ([xo[:, k, :] for k in range(K)]          # 2C * D = 256 lanes
              + [h[:, k, :] for k in range(K)]         # 2C * D = 256 lanes
              + att_pieces)                            # 4 * 128 = 512 lanes
    out_ref[...] = jnp.concatenate(pieces, axis=-1)    # (BB, 1024), unmasked stores


def att_select_pallas(x1, x2, w_fc, b_fc, w_q, b_q, *, batch_grid=None):
    """Full forward pass of `att_select`.

    x1, x2 : (B, N, D) float32 bags of instances
    w_fc   : (C, D), b_fc : (C,)   -- selectmax.fc (PyTorch (out, in) layout)
    w_q    : (D, D), b_q  : (D,)   -- q[2] linear  (PyTorch (out, in) layout)
    Returns (x, x1, x2, h1, h2, ATT1, ATT2, att11, att22, att12, att21).
    """
    B, N, D = x1.shape
    C = w_fc.shape[0]
    assert x2.shape == (B, N, D)
    # The PyTorch module hardcodes the attention split at 60 instances; this
    # kernel splits at the bag boundary, which matches only when N == 60.
    assert N == 60, "att_select hardcodes a split at 60 instances per bag"

    f32 = jnp.float32
    NN = 2 * N
    att_w = ((NN + 127) // 128) * 128          # 120 -> 128 padded (lane-dense rows)
    out_w = 4 * C * D + 4 * att_w              # feature slab + 4 attention rows

    if batch_grid is None:
        batch_grid = 1
        try:
            kind = jax.devices()[0].device_kind.lower().replace(" ", "")
        except Exception:  # pragma: no cover - defensive only
            kind = ""
        # v5e / v6e have a single TensorCore -> a batch grid is pure serial
        # overhead.  Only split on dual-core parts (v7x) and only when each
        # core's block stays sublane-aligned (BB % 8 == 0) and non-trivial.
        if ("v7" in kind or "tpu7" in kind) and B % 16 == 0:
            batch_grid = 2
    assert B % batch_grid == 0
    BB = B // batch_grid
    assert batch_grid == 1 or BB % 8 == 0, "per-core batch block must be sublane aligned"

    # Pre-stack the bags on the instance axis (one HBM array, one input stream).
    x_all = jnp.concatenate([x1.astype(f32), x2.astype(f32)], axis=1)      # (B, 2N, D)

    grid_spec = pltpu.PrefetchScalarGridSpec(
        num_scalar_prefetch=0,
        grid=(batch_grid,),
        in_specs=[
            pl.BlockSpec((BB, NN, D), lambda b: (b, 0, 0)),   # x_all
            pl.BlockSpec((D, C), lambda b: (0, 0)),           # w_fc^T
            pl.BlockSpec((1, C), lambda b: (0, 0)),           # b_fc
            pl.BlockSpec((D, D), lambda b: (0, 0)),           # w_q^T
            pl.BlockSpec((1, D), lambda b: (0, 0)),           # b_q
        ],
        out_specs=pl.BlockSpec((BB, out_w), lambda b: (b, 0)),
    )

    out = pl.pallas_call(
        _att_select_kernel,
        out_shape=jax.ShapeDtypeStruct((B, out_w), f32),
        grid_spec=grid_spec,
        compiler_params=pltpu.CompilerParams(
            dimension_semantics=("parallel",)),
    )(x_all,
      w_fc.T.astype(f32), b_fc.reshape(1, C).astype(f32),
      w_q.T.astype(f32), b_q.reshape(1, D).astype(f32))

    # ---- wrapper-side unpacking: pure slices / reshapes / one tiny concat ----
    cd2 = 2 * C * D
    xo = out[:, :cd2].reshape(B, 2, C, D)
    hh = out[:, cd2:2 * cd2].reshape(B, 2, C, D)
    x1o, x2o = xo[:, 0], xo[:, 1]
    h1, h2 = hh[:, 0], hh[:, 1]
    x = jnp.concatenate([x1o, x2o], axis=-1)                 # (B, C, 2D)

    att = out[:, 2 * cd2:].reshape(B, 4, att_w)
    row0 = att[:, 0, :NN]
    rowc = att[:, 1, :NN]
    sum1 = att[:, 2, :NN]
    sum2 = att[:, 3, :NN]
    ATT1 = row0[:, :N, None]       # A1[:, :60, :1]
    ATT2 = rowc[:, N:, None]       # A2[:, 60:, :1]
    att11 = sum1[:, :N]            # A1[:, :60, 1:].sum(2)
    att12 = sum1[:, N:]            # A1[:, 60:, 1:].sum(2)
    att21 = sum2[:, :N]            # A2[:, :60, 1:].sum(2)
    att22 = sum2[:, N:]            # A2[:, 60:, 1:].sum(2)

    return (x, x1o, x2o, h1, h2, ATT1, ATT2, att11, att22, att12, att21)


def att_select_reference(x1, x2, w_fc, b_fc, w_q, b_q):
    """Pure-JAX reference mirroring the PyTorch forward, for correctness check."""
    B, N, D = x1.shape

    def select(x):
        out = jnp.einsum('bnd,cd->bnc', x, w_fc) + b_fc
        idx = jnp.argmax(out, axis=1)                               # (B, C)
        return jnp.take_along_axis(x, idx[:, :, None], axis=1)      # (B, C, D)

    h1 = select(x1)
    h2 = select(x2)
    L = jnp.concatenate([x1, x2], axis=1)

    def attend(h):
        q = jnp.einsum('bcd,ed->bce', jnp.tanh(h), w_q) + b_q       # (B, C, D)
        A = jnp.einsum('bnd,bcd->bnc', L, q) / jnp.sqrt(jnp.float32(D))
        A = jax.nn.softmax(A, axis=1)
        xo = jnp.einsum('bnc,bnd->bcd', A, L)
        return 0.9 * xo + 0.1 * q, A

    x1o, A1 = attend(h1)
    x2o, A2 = attend(h2)
    SPLIT = 60
    return (jnp.concatenate([x1o, x2o], axis=2), x1o, x2o, h1, h2,
            A1[:, :SPLIT, :1], A2[:, SPLIT:, :1],
            A1[:, :SPLIT, 1:].sum(axis=2), A2[:, SPLIT:, 1:].sum(axis=2),
            A1[:, SPLIT:, 1:].sum(axis=2), A2[:, :SPLIT, 1:].sum(axis=2))


if __name__ == "__main__":
    B, N, D, C = 2, 60, 32, 4   # batch, instances per bag, input_size, num_class

    key = jax.random.PRNGKey(0)
    k_x1, k_x2, k_wfc, k_bfc, k_wq, k_bq = jax.random.split(key, 6)

    x1 = jax.random.normal(k_x1, (B, N, D), jnp.float32)
    x2 = jax.random.normal(k_x2, (B, N, D), jnp.float32)

    # Deterministic nn.Linear-style init (uniform(-1/sqrt(fan_in), 1/sqrt(fan_in))).
    bound = 1.0 / math.sqrt(D)
    w_fc = jax.random.uniform(k_wfc, (C, D), jnp.float32, -bound, bound)
    b_fc = jax.random.uniform(k_bfc, (C,), jnp.float32, -bound, bound)
    w_q = jax.random.uniform(k_wq, (D, D), jnp.float32, -bound, bound)
    b_q = jax.random.uniform(k_bq, (D,), jnp.float32, -bound, bound)

    run = jax.jit(att_select_pallas)
    outs = jax.block_until_ready(run(x1, x2, w_fc, b_fc, w_q, b_q))

    refs = att_select_reference(x1, x2, w_fc, b_fc, w_q, b_q)
    for o, r in zip(outs, refs):
        np.testing.assert_allclose(np.asarray(o), np.asarray(r),
                                   rtol=1e-4, atol=1e-4)

    print("KERNEL_OK")
</pallas_src>

<mosaic_0001>
module attributes {stable_mosaic.version = 11 : i64} {
  func.func @_att_select_kernel(%arg0: i32, %arg1: memref<2x120x32xf32, #tpu.memory_space<vmem>>, %arg2: memref<32x4xf32, #tpu.memory_space<vmem>>, %arg3: memref<1x4xf32, #tpu.memory_space<vmem>>, %arg4: memref<32x32xf32, #tpu.memory_space<vmem>>, %arg5: memref<1x32xf32, #tpu.memory_space<vmem>>, %arg6: memref<2x1024xf32, #tpu.memory_space<vmem>>) attributes {dimension_semantics = [#tpu.dimension_semantics<parallel>], iteration_bounds = array<i64: 1>, scalar_prefetch = 0 : i64, scratch_operands = 0 : i64, tpu.core_type = #tpu.core_type<tc>, window_params = [{transform_indices = @transform_0, window_bounds = array<i64: 2, 120, 32>}, {pipeline_mode = #tpu.pipeline_mode<synchronous>, transform_indices = @transform_1, window_bounds = array<i64: 32, 4>}, {pipeline_mode = #tpu.pipeline_mode<synchronous>, transform_indices = @transform_2, window_bounds = array<i64: 1, 4>}, {pipeline_mode = #tpu.pipeline_mode<synchronous>, transform_indices = @transform_3, window_bounds = array<i64: 32, 32>}, {pipeline_mode = #tpu.pipeline_mode<synchronous>, transform_indices = @transform_4, window_bounds = array<i64: 1, 32>}, {transform_indices = @transform_5, window_bounds = array<i64: 2, 1024>}]} {
    %c0 = arith.constant 0 : index
    %c0_0 = arith.constant 0 : index
    %c0_1 = arith.constant 0 : index
    %0 = vector.load %arg1[%c0, %c0_0, %c0_1] : memref<2x120x32xf32, #tpu.memory_space<vmem>>, vector<2x120x32xf32>
    %c0_2 = arith.constant 0 : index
    %c0_3 = arith.constant 0 : index
    %1 = vector.load %arg2[%c0_2, %c0_3] : memref<32x4xf32, #tpu.memory_space<vmem>>, vector<32x4xf32>
    %c0_4 = arith.constant 0 : index
    %c0_5 = arith.constant 0 : index
    %2 = vector.load %arg3[%c0_4, %c0_5] : memref<1x4xf32, #tpu.memory_space<vmem>>, vector<1x4xf32>
    %c0_6 = arith.constant 0 : index
    %c0_7 = arith.constant 0 : index
    %3 = vector.load %arg4[%c0_6, %c0_7] : memref<32x32xf32, #tpu.memory_space<vmem>>, vector<32x32xf32>
    %c0_8 = arith.constant 0 : index
    %c0_9 = arith.constant 0 : index
    %4 = vector.load %arg5[%c0_8, %c0_9] : memref<1x32xf32, #tpu.memory_space<vmem>>, vector<1x32xf32>
    %5 = vector.shape_cast %0 : vector<2x120x32xf32> to vector<240x32xf32>
    %cst = arith.constant dense<0.000000e+00> : vector<240x4xf32>
    %6 = tpu.matmul %5, %1, %cst {dimension_numbers = #tpu.dot_dimension_numbers<[1], [0], [0], [1], [0, 0, 1, 1], [], []>} : vector<240x32xf32>, vector<32x4xf32>, vector<240x4xf32> -> vector<240x4xf32>
    %7 = vector.broadcast %2 : vector<1x4xf32> to vector<240x4xf32>
    %8 = arith.addf %6, %7 : vector<240x4xf32>
    %9 = vector.shape_cast %8 : vector<240x4xf32> to vector<2x120x4xf32>
    %10 = tpu.transpose %9, [0, 2, 1] : vector<2x120x4xf32> -> vector<2x4x120xf32>
    %11 = tpu.iota {dimensions = array<i32: 2>} : vector<2x4x120xi32>
    %12 = vector.extract_strided_slice %10 {offsets = [0, 0, 0], sizes = [2, 4, 60], strides = [1, 1, 1]} : vector<2x4x120xf32> to vector<2x4x60xf32>
    %13 = vector.extract_strided_slice %10 {offsets = [0, 0, 60], sizes = [2, 4, 60], strides = [1, 1, 1]} : vector<2x4x120xf32> to vector<2x4x60xf32>
    %14 = vector.extract_strided_slice %11 {offsets = [0, 0, 0], sizes = [2, 4, 60], strides = [1, 1, 1]} : vector<2x4x120xi32> to vector<2x4x60xi32>
    %15 = vector.extract_strided_slice %11 {offsets = [0, 0, 60], sizes = [2, 4, 60], strides = [1, 1, 1]} : vector<2x4x120xi32> to vector<2x4x60xi32>
    %cst_10 = arith.constant dense<0xFF800000> : vector<2x4xf32>
    %16 = vector.multi_reduction <maximumf>, %12, %cst_10 [2] : vector<2x4x60xf32> to vector<2x4xf32>
    %17 = vector.shape_cast %16 : vector<2x4xf32> to vector<2x4x1xf32>
    %18 = vector.broadcast %17 : vector<2x4x1xf32> to vector<2x4x60xf32>
    %19 = arith.cmpf oeq, %12, %18 : vector<2x4x60xf32>
    %c120_i32 = arith.constant 120 : i32
    %20 = vector.broadcast %c120_i32 : i32 to vector<2x4x60xi32>
    %21 = arith.select %19, %14, %20 : vector<2x4x60xi1>, vector<2x4x60xi32>
    %cst_11 = arith.constant dense<2147483647> : vector<2x4xi32>
    %22 = vector.multi_reduction <minsi>, %21, %cst_11 [2] : vector<2x4x60xi32> to vector<2x4xi32>
    %23 = vector.shape_cast %22 : vector<2x4xi32> to vector<2x4x1xi32>
    %cst_12 = arith.constant dense<0xFF800000> : vector<2x4xf32>
    %24 = vector.multi_reduction <maximumf>, %13, %cst_12 [2] : vector<2x4x60xf32> to vector<2x4xf32>
    %25 = vector.shape_cast %24 : vector<2x4xf32> to vector<2x4x1xf32>
    %26 = vector.broadcast %25 : vector<2x4x1xf32> to vector<2x4x60xf32>
    %27 = arith.cmpf oeq, %13, %26 : vector<2x4x60xf32>
    %c120_i32_13 = arith.constant 120 : i32
    %28 = vector.broadcast %c120_i32_13 : i32 to vector<2x4x60xi32>
    %29 = arith.select %27, %15, %28 : vector<2x4x60xi1>, vector<2x4x60xi32>
    %cst_14 = arith.constant dense<2147483647> : vector<2x4xi32>
    %30 = vector.multi_reduction <minsi>, %29, %cst_14 [2] : vector<2x4x60xi32> to vector<2x4xi32>
    %31 = vector.shape_cast %30 : vector<2x4xi32> to vector<2x4x1xi32>
    %32 = vector.broadcast %23 : vector<2x4x1xi32> to vector<2x4x120xi32>
    %33 = arith.cmpi eq, %11, %32 : vector<2x4x120xi32>
    %34 = arith.extui %33 : vector<2x4x120xi1> to vector<2x4x120xi32>
    %35 = arith.sitofp %34 : vector<2x4x120xi32> to vector<2x4x120xf32>
    %36 = vector.broadcast %31 : vector<2x4x1xi32> to vector<2x4x120xi32>
    %37 = arith.cmpi eq, %11, %36 : vector<2x4x120xi32>
    %38 = arith.extui %37 : vector<2x4x120xi1> to vector<2x4x120xi32>
    %39 = arith.sitofp %38 : vector<2x4x120xi32> to vector<2x4x120xf32>
    %40 = tpu.concatenate %35, %39 in 1 : vector<2x4x120xf32>, vector<2x4x120xf32> -> vector<2x8x120xf32>
    "tpu.trace_start"() <{level = 10 : i32, message = "bkn,bnd->bkd"}> : () -> ()
    %cst_15 = arith.constant dense<0.000000e+00> : vector<2x8x32xf32>
    %41 = tpu.matmul %40, %0, %cst_15 {dimension_numbers = #tpu.dot_dimension_numbers<[2], [1], [1], [2], [0, 0, 0, 1, 1, 2], [0], [0]>} : vector<2x8x120xf32>, vector<2x120x32xf32>, vector<2x8x32xf32> -> vector<2x8x32xf32>
    "tpu.trace_stop"() : () -> ()
    %42 = math.tanh %41 : vector<2x8x32xf32>
    %43 = vector.shape_cast %42 : vector<2x8x32xf32> to vector<16x32xf32>
    %cst_16 = arith.constant dense<0.000000e+00> : vector<16x32xf32>
    %44 = tpu.matmul %43, %3, %cst_16 {dimension_numbers = #tpu.dot_dimension_numbers<[1], [0], [0], [1], [0, 0, 1, 1], [], []>} : vector<16x32xf32>, vector<32x32xf32>, vector<16x32xf32> -> vector<16x32xf32>
    %45 = vector.broadcast %4 : vector<1x32xf32> to vector<16x32xf32>
    %46 = arith.addf %44, %45 : vector<16x32xf32>
    %47 = vector.shape_cast %46 : vector<16x32xf32> to vector<2x8x32xf32>
    "tpu.trace_start"() <{level = 10 : i32, message = "bkd,bnd->bkn"}> : () -> ()
    %cst_17 = arith.constant dense<0.000000e+00> : vector<2x8x120xf32>
    %48 = tpu.matmul %47, %0, %cst_17 {dimension_numbers = #tpu.dot_dimension_numbers<[2], [2], [1], [1], [0, 0, 0, 1, 1, 1], [0], [0]>} : vector<2x8x32xf32>, vector<2x120x32xf32>, vector<2x8x120xf32> -> vector<2x8x120xf32>
    "tpu.trace_stop"() : () -> ()
    %cst_18 = arith.constant 0.176776692 : f32
    %49 = vector.broadcast %cst_18 : f32 to vector<2x8x120xf32>
    %50 = arith.mulf %48, %49 : vector<2x8x120xf32>
    %cst_19 = arith.constant dense<0xFF800000> : vector<2x8xf32>
    %51 = vector.multi_reduction <maximumf>, %50, %cst_19 [2] : vector<2x8x120xf32> to vector<2x8xf32>
    %52 = vector.shape_cast %51 : vector<2x8xf32> to vector<2x8x1xf32>
    %53 = vector.broadcast %52 : vector<2x8x1xf32> to vector<2x8x120xf32>
    %54 = arith.subf %50, %53 : vector<2x8x120xf32>
    %55 = math.exp %54 : vector<2x8x120xf32>
    %cst_20 = arith.constant dense<0.000000e+00> : vector<2x8xf32>
    %56 = vector.multi_reduction <add>, %55, %cst_20 [2] : vector<2x8x120xf32> to vector<2x8xf32>
    %57 = vector.shape_cast %56 : vector<2x8xf32> to vector<2x8x1xf32>
    %58 = tpu.reciprocal %57 : vector<2x8x1xf32> -> vector<2x8x1xf32>
    %59 = vector.broadcast %58 : vector<2x8x1xf32> to vector<2x8x120xf32>
    %60 = arith.mulf %55, %59 : vector<2x8x120xf32>
    "tpu.trace_start"() <{level = 10 : i32, message = "bkn,bnd->bkd"}> : () -> ()
    %cst_21 = arith.constant dense<0.000000e+00> : vector<2x8x32xf32>
    %61 = tpu.matmul %60, %0, %cst_21 {dimension_numbers = #tpu.dot_dimension_numbers<[2], [1], [1], [2], [0, 0, 0, 1, 1, 2], [0], [0]>} : vector<2x8x120xf32>, vector<2x120x32xf32>, vector<2x8x32xf32> -> vector<2x8x32xf32>
    "tpu.trace_stop"() : () -> ()
    %cst_22 = arith.constant 0.899999976 : f32
    %62 = vector.broadcast %cst_22 : f32 to vector<2x8x32xf32>
    %63 = arith.mulf %62, %61 : vector<2x8x32xf32>
    %cst_23 = arith.constant 1.000000e-01 : f32
    %64 = vector.broadcast %cst_23 : f32 to vector<2x8x32xf32>
    %65 = arith.mulf %64, %47 : vector<2x8x32xf32>
    %66 = arith.addf %63, %65 : vector<2x8x32xf32>
    %67 = vector.extract_strided_slice %60 {offsets = [0, 0, 0], sizes = [2, 1, 120], strides = [1, 1, 1]} : vector<2x8x120xf32> to vector<2x1x120xf32>
    %68 = vector.shape_cast %67 : vector<2x1x120xf32> to vector<2x120xf32>
    %69 = vector.extract_strided_slice %60 {offsets = [0, 4, 0], sizes = [2, 1, 120], strides = [1, 1, 1]} : vector<2x8x120xf32> to vector<2x1x120xf32>
    %70 = vector.shape_cast %69 : vector<2x1x120xf32> to vector<2x120xf32>
    %71 = vector.extract_strided_slice %60 {offsets = [0, 1, 0], sizes = [2, 3, 120], strides = [1, 1, 1]} : vector<2x8x120xf32> to vector<2x3x120xf32>
    %cst_24 = arith.constant dense<0.000000e+00> : vector<2x120xf32>
    %72 = vector.multi_reduction <add>, %71, %cst_24 [1] : vector<2x3x120xf32> to vector<2x120xf32>
    %73 = vector.extract_strided_slice %60 {offsets = [0, 5, 0], sizes = [2, 3, 120], strides = [1, 1, 1]} : vector<2x8x120xf32> to vector<2x3x120xf32>
    %cst_25 = arith.constant dense<0.000000e+00> : vector<2x120xf32>
    %74 = vector.multi_reduction <add>, %73, %cst_25 [1] : vector<2x3x120xf32> to vector<2x120xf32>
    %cst_26 = arith.constant 0.000000e+00 : f32
    %75 = vector.broadcast %cst_26 : f32 to vector<2x8xf32>
    %76 = vector.extract_strided_slice %66 {offsets = [0, 0, 0], sizes = [2, 1, 32], strides = [1, 1, 1]} : vector<2x8x32xf32> to vector<2x1x32xf32>
    %77 = vector.shape_cast %76 : vector<2x1x32xf32> to vector<2x32xf32>
    %78 = vector.extract_strided_slice %66 {offsets = [0, 1, 0], sizes = [2, 1, 32], strides = [1, 1, 1]} : vector<2x8x32xf32> to vector<2x1x32xf32>
    %79 = vector.shape_cast %78 : vector<2x1x32xf32> to vector<2x32xf32>
    %80 = vector.extract_strided_slice %66 {offsets = [0, 2, 0], sizes = [2, 1, 32], strides = [1, 1, 1]} : vector<2x8x32xf32> to vector<2x1x32xf32>
    %81 = vector.shape_cast %80 : vector<2x1x32xf32> to vector<2x32xf32>
    %82 = vector.extract_strided_slice %66 {offsets = [0, 3, 0], sizes = [2, 1, 32], strides = [1, 1, 1]} : vector<2x8x32xf32> to vector<2x1x32xf32>
    %83 = vector.shape_cast %82 : vector<2x1x32xf32> to vector<2x32xf32>
    %84 = vector.extract_strided_slice %66 {offsets = [0, 4, 0], sizes = [2, 1, 32], strides = [1, 1, 1]} : vector<2x8x32xf32> to vector<2x1x32xf32>
    %85 = vector.shape_cast %84 : vector<2x1x32xf32> to vector<2x32xf32>
    %86 = vector.extract_strided_slice %66 {offsets = [0, 5, 0], sizes = [2, 1, 32], strides = [1, 1, 1]} : vector<2x8x32xf32> to vector<2x1x32xf32>
    %87 = vector.shape_cast %86 : vector<2x1x32xf32> to vector<2x32xf32>
    %88 = vector.extract_strided_slice %66 {offsets = [0, 6, 0], sizes = [2, 1, 32], strides = [1, 1, 1]} : vector<2x8x32xf32> to vector<2x1x32xf32>
    %89 = vector.shape_cast %88 : vector<2x1x32xf32> to vector<2x32xf32>
    %90 = vector.extract_strided_slice %66 {offsets = [0, 7, 0], sizes = [2, 1, 32], strides = [1, 1, 1]} : vector<2x8x32xf32> to vector<2x1x32xf32>
    %91 = vector.shape_cast %90 : vector<2x1x32xf32> to vector<2x32xf32>
    %92 = vector.extract_strided_slice %41 {offsets = [0, 0, 0], sizes = [2, 1, 32], strides = [1, 1, 1]} : vector<2x8x32xf32> to vector<2x1x32xf32>
    %93 = vector.shape_cast %92 : vector<2x1x32xf32> to vector<2x32xf32>
    %94 = vector.extract_strided_slice %41 {offsets = [0, 1, 0], sizes = [2, 1, 32], strides = [1, 1, 1]} : vector<2x8x32xf32> to vector<2x1x32xf32>
    %95 = vector.shape_cast %94 : vector<2x1x32xf32> to vector<2x32xf32>
    %96 = vector.extract_strided_slice %41 {offsets = [0, 2, 0], sizes = [2, 1, 32], strides = [1, 1, 1]} : vector<2x8x32xf32> to vector<2x1x32xf32>
    %97 = vector.shape_cast %96 : vector<2x1x32xf32> to vector<2x32xf32>
    %98 = vector.extract_strided_slice %41 {offsets = [0, 3, 0], sizes = [2, 1, 32], strides = [1, 1, 1]} : vector<2x8x32xf32> to vector<2x1x32xf32>
    %99 = vector.shape_cast %98 : vector<2x1x32xf32> to vector<2x32xf32>
    %100 = vector.extract_strided_slice %41 {offsets = [0, 4, 0], sizes = [2, 1, 32], strides = [1, 1, 1]} : vector<2x8x32xf32> to vector<2x1x32xf32>
    %101 = vector.shape_cast %100 : vector<2x1x32xf32> to vector<2x32xf32>
    %102 = vector.extract_strided_slice %41 {offsets = [0, 5, 0], sizes = [2, 1, 32], strides = [1, 1, 1]} : vector<2x8x32xf32> to vector<2x1x32xf32>
    %103 = vector.shape_cast %102 : vector<2x1x32xf32> to vector<2x32xf32>
    %104 = vector.extract_strided_slice %41 {offsets = [0, 6, 0], sizes = [2, 1, 32], strides = [1, 1, 1]} : vector<2x8x32xf32> to vector<2x1x32xf32>
    %105 = vector.shape_cast %104 : vector<2x1x32xf32> to vector<2x32xf32>
    %106 = vector.extract_strided_slice %41 {offsets = [0, 7, 0], sizes = [2, 1, 32], strides = [1, 1, 1]} : vector<2x8x32xf32> to vector<2x1x32xf32>
    %107 = vector.shape_cast %106 : vector<2x1x32xf32> to vector<2x32xf32>
    %108 = tpu.concatenate %77, %79, %81, %83, %85, %87, %89, %91, %93, %95, %97, %99, %101, %103, %105, %107 in 1 : vector<2x32xf32>, vector<2x32xf32>, vector<2x32xf32>, vector<2x32xf32>, vector<2x32xf32>, vector<2x32xf32>, vector<2x32xf32>, vector<2x32xf32>, vector<2x32xf32>, vector<2x32xf32>, vector<2x32xf32>, vector<2x32xf32>, vector<2x32xf32>, vector<2x32xf32>, vector<2x32xf32>, vector<2x32xf32> -> vector<2x512xf32>
    %109 = tpu.concatenate %68, %75, %70, %75, %72, %75, %74, %75 in 1 : vector<2x120xf32>, vector<2x8xf32>, vector<2x120xf32>, vector<2x8xf32>, vector<2x120xf32>, vector<2x8xf32>, vector<2x120xf32>, vector<2x8xf32> -> vector<2x512xf32>
    %110 = tpu.concatenate %108, %109 in 1 : vector<2x512xf32>, vector<2x512xf32> -> vector<2x1024xf32>
    %c0_27 = arith.constant 0 : index
    %c0_28 = arith.constant 0 : index
    %111 = vector.load %arg6[%c0_27, %c0_28] : memref<2x1024xf32, #tpu.memory_space<vmem>>, vector<2x1024xf32>
    tpu.vector_store %arg6[%c0_27, %c0_28], %110 {strides = array<i32>} : memref<2x1024xf32, #tpu.memory_space<vmem>>, vector<2x1024xf32>,
    return
  }
  func.func @transform_0(%arg0: i32) -> (i32, i32, i32) {
    %c0_i32 = arith.constant 0 : i32
    %c0_i32_0 = arith.constant 0 : i32
    %c0_i32_1 = arith.constant 0 : i32
    return %arg0, %c0_i32, %c0_i32_0 : i32, i32, i32
  }
  func.func @transform_1(%arg0: i32) -> (i32, i32) {
    %c0_i32 = arith.constant 0 : i32
    %c0_i32_0 = arith.constant 0 : i32
    %c0_i32_1 = arith.constant 0 : i32
    return %c0_i32, %c0_i32_0 : i32, i32
  }
  func.func @transform_2(%arg0: i32) -> (i32, i32) {
    %c0_i32 = arith.constant 0 : i32
    %c0_i32_0 = arith.constant 0 : i32
    %c0_i32_1 = arith.constant 0 : i32
    return %c0_i32, %c0_i32_0 : i32, i32
  }
  func.func @transform_3(%arg0: i32) -> (i32, i32) {
    %c0_i32 = arith.constant 0 : i32
    %c0_i32_0 = arith.constant 0 : i32
    %c0_i32_1 = arith.constant 0 : i32
    return %c0_i32, %c0_i32_0 : i32, i32
  }
  func.func @transform_4(%arg0: i32) -> (i32, i32) {
    %c0_i32 = arith.constant 0 : i32
    %c0_i32_0 = arith.constant 0 : i32
    %c0_i32_1 = arith.constant 0 : i32
    return %c0_i32, %c0_i32_0 : i32, i32
  }
  func.func @transform_5(%arg0: i32) -> (i32, i32) {
    %c0_i32 = arith.constant 0 : i32
    %c0_i32_0 = arith.constant 0 : i32
    return %arg0, %c0_i32 : i32, i32
  }
}

</mosaic_0001>

<bundles_post_ra>
// kernel: att_select_pallas.1
= control target key start
LH: loop header
LB: loop body
LE: loop exit
PB: predicated region body
PF: predicated region fallthrough
CT: control target
= control target key end

     0   :  { %vm66_vm0 = vcmask 261120   ;;  %vm479_vm1 = vcmask 978400   ;;  %vm438_vm2 = vcmask 486400   ;;  %vm1799_vm9 = vmmov 0   ;;  %s1801_s17 = smov 64   ;;  %s1803_s20 = smov 96   ;;  %s2450_s1 = inlined_call_operand.vmem [shape: f32[32,4], index: 1, kind: input, shape index: {}]   ;;  %s2451_s0 = inlined_call_operand.vmem [shape: f32[2,120,32], index: 0, kind: input, shape index: {}]   ;;  %s2452_s2 = inlined_call_operand.vmem [shape: f32[1,4], index: 2, kind: input, shape index: {}]   ;;  %s2453_s3 = inlined_call_operand.vmem [shape: f32[32,32], index: 3, kind: input, shape index: {}]   ;;  %s2454_s4 = inlined_call_operand.vmem [shape: f32[1,32], index: 4, kind: input, shape index: {}]   ;;  %s2455_s5 = inlined_call_operand.vmem [shape: f32[2,1024], index: 5, kind: output, shape index: {}]  }
   0x1   :  { %v53_v0 = vld [vmem:[%s2450_s1 + $0x18] sm:$0xff]  ;;  %v52_v1 = vld [vmem:[%s2450_s1 + $0x10] sm:$0xff]  ;;  %v1843_v2 = vld [vmem:[%s2451_s0] sm:$0xff]  ;;  %vm538_vm14 = vcmask 1043456   ;;  %vm541_vm15 = vcmask 982016  }
   0x2   :  { %1518 = vmatprep.subr.mxu0 %v53_v0  ;;  %v51_v3 = vld [vmem:[%s2450_s1 + $0x8] sm:$0xff]  ;;  %1526 = vmatprep.mubr.msk.f32.mxu0 %vm66_vm0, %v1843_v2  ;;  %v50_v4 = vld [vmem:[%s2450_s1] sm:$0xff]  ;;  %v1861_v6 = vld [vmem:[%s2451_s0 + $0x10] sm:$0xff] }
   0x3   :  { %1519 = vmatpush3.msra.mxu0 %v53_v0  ;;  %v1856_v5 = vld [vmem:[%s2451_s0 + $0x8] sm:$0xff]  ;;  %v1870_v7 = vld [vmem:[%s2451_s0 + $0x18] sm:$0xff]  ;;  %v1875_v8 = vld [vmem:[%s2451_s0 + $0x20] sm:$0xff] }
   0x4   :  { %1520 = vmatprep.subr.mxu0 %v52_v1  ;;  %v1884_v9 = vld [vmem:[%s2451_s0 + $0x28] sm:$0xff]  ;;  %v1889_v10 = vld [vmem:[%s2451_s0 + $0x30] sm:$0xff]  ;;  %v1898_v11 = vld [vmem:[%s2451_s0 + $0x38] sm:$0xff] }
   0x5   :  { %1521 = vmatpush3.msra.mxu0 %v52_v1  ;;  %v1903_v12 = vld [vmem:[%s2451_s0 + $0x40] sm:$0xff]  ;;  %v1912_v13 = vld [vmem:[%s2451_s0 + $0x48] sm:$0xff]  ;;  %v1917_v14 = vld [vmem:[%s2451_s0 + $0x50] sm:$0xff] }
   0x6   :  { %1522 = vmatprep.subr.mxu0 %v51_v3  ;;  %v1926_v15 = vld [vmem:[%s2451_s0 + $0x58] sm:$0xff]  ;;  %v1931_v16 = vld [vmem:[%s2451_s0 + $0x60] sm:$0xff]  ;;  %v1940_v17 = vld [vmem:[%s2451_s0 + $0x68] sm:$0xff] }
   0x7   :  { %1523 = vmatpush3.msra.mxu0 %v51_v3  ;;  %v1945_v18 = vld [vmem:[%s2451_s0 + $0x70] sm:$0xff]  ;;  %v1954_v19 = vld [vmem:[%s2451_s0 + $0x78] sm:$0xff]  ;;  %v1959_v20 = vld [vmem:[%s2451_s0 + $0x80] sm:$0xff] }
   0x8   :  { %1524 = vmatprep.subr.mxu0 %v50_v4  ;;  %v1968_v21 = vld [vmem:[%s2451_s0 + $0x88] sm:$0xff]  ;;  %v1973_v22 = vld [vmem:[%s2451_s0 + $0x90] sm:$0xff]  ;;  %v1982_v23 = vld [vmem:[%s2451_s0 + $0x98] sm:$0xff] }
   0x9   :  { %1525 = vmatpush3.msra.mxu0 %v50_v4  ;;  %v1987_v24 = vld [vmem:[%s2451_s0 + $0xa0] sm:$0xff]  ;;  %v1996_v25 = vld [vmem:[%s2451_s0 + $0xa8] sm:$0xff]  ;;  %v2001_v26 = vld [vmem:[%s2451_s0 + $0xb0] sm:$0xff] }
   0xa   :  { %1527 = vmatmul.mubr.msk.f32.vlgmr.msra.gmra.mxu0 %vm66_vm0, %v1856_v5  ;;  %v2010_v27 = vld [vmem:[%s2451_s0 + $0xb8] sm:$0xff]  ;;  %v2015_v28 = vld [vmem:[%s2451_s0 + $0xc0] sm:$0xff]  ;;  %v2024_v29 = vld [vmem:[%s2451_s0 + $0xc8] sm:$0xff] }
   0xb   :  { %1529 = vmatprep.mubr.msk.f32.mxu0 %vm66_vm0, %v1861_v6  ;;  %v2029_v30 = vld [vmem:[%s2451_s0 + $0xd0] sm:$0xff]  ;;  %v2038_v31 = vld [vmem:[%s2451_s0 + $0xd8] sm:$0xff]  ;;  %v2043_v32 = vld [vmem:[%s2451_s0 + $0xe0] sm:$0xff] }
   0xc   :  { %v2052_v33 = vld [vmem:[%s2451_s0 + $0xe8] sm:$0xff]  ;;  %v2059_v35 = vld [vmem:[%s2452_s2] ss:$0 sm:$0xff] }
   0xe   :  { %1530 = vmatmul.mubr.msk.f32.gmra.mxu0 %vm66_vm0, %v1870_v7 }
   0xf   :  { %1532 = vmatprep.mubr.msk.f32.mxu0 %vm66_vm0, %v1875_v8 }
  0x12   :  { %1533 = vmatmul.mubr.msk.f32.gmra.mxu0 %vm66_vm0, %v1884_v9 }
  0x13   :  { %1535 = vmatprep.mubr.msk.f32.mxu0 %vm66_vm0, %v1889_v10 }
  0x16   :  { %1536 = vmatmul.mubr.msk.f32.gmra.mxu0 %vm66_vm0, %v1898_v11 }
  0x17   :  { %1538 = vmatprep.mubr.msk.f32.mxu0 %vm66_vm0, %v1903_v12 }
  0x1a   :  { %1539 = vmatmul.mubr.msk.f32.gmra.mxu0 %vm66_vm0, %v1912_v13 }
  0x1b   :  { %1541 = vmatprep.mubr.msk.f32.mxu0 %vm66_vm0, %v1917_v14 }
  0x1e   :  { %1542 = vmatmul.mubr.msk.f32.gmra.mxu0 %vm66_vm0, %v1926_v15 }
  0x1f   :  { %1544 = vmatprep.mubr.msk.f32.mxu0 %vm66_vm0, %v1931_v16 }
  0x22   :  { %1545 = vmatmul.mubr.msk.f32.gmra.mxu0 %vm66_vm0, %v1940_v17 }
  0x23   :  { %1547 = vmatprep.mubr.msk.f32.mxu0 %vm66_vm0, %v1945_v18 }
  0x26   :  { %1548 = vmatmul.mubr.msk.f32.gmra.mxu0 %vm66_vm0, %v1954_v19 }
  0x27   :  { %1550 = vmatprep.mubr.msk.f32.mxu0 %vm66_vm0, %v1959_v20 }
  0x2a   :  { %1551 = vmatmul.mubr.msk.f32.gmra.mxu0 %vm66_vm0, %v1968_v21 }
  0x2b   :  { %1553 = vmatprep.mubr.msk.f32.mxu0 %vm66_vm0, %v1973_v22 }
  0x2e   :  { %1554 = vmatmul.mubr.msk.f32.gmra.mxu0 %vm66_vm0, %v1982_v23 }
  0x2f   :  { %1556 = vmatprep.mubr.msk.f32.mxu0 %vm66_vm0, %v1987_v24 }
  0x32   :  { %1557 = vmatmul.mubr.msk.f32.gmra.mxu0 %vm66_vm0, %v1996_v25 }
  0x33   :  { %1559 = vmatprep.mubr.msk.f32.mxu0 %vm66_vm0, %v2001_v26 }
  0x36   :  { %1560 = vmatmul.mubr.msk.f32.gmra.mxu0 %vm66_vm0, %v2010_v27 }
  0x37   :  { %1562 = vmatprep.mubr.msk.f32.mxu0 %vm66_vm0, %v2015_v28 }
  0x3a   :  { %1563 = vmatmul.mubr.msk.f32.gmra.mxu0 %vm66_vm0, %v2024_v29 }
  0x3b   :  { %1565 = vmatprep.mubr.msk.f32.mxu0 %vm66_vm0, %v2029_v30 }
  0x3e   :  { %1566 = vmatmul.mubr.msk.f32.gmra.mxu0 %vm66_vm0, %v2038_v31 }
  0x3f   :  { %1568 = vmatprep.mubr.msk.f32.mxu0 %vm66_vm0, %v2043_v32 }
  0x42   :  { %1569 = vmatmul.mubr.msk.f32.gmra.mxu0 %vm66_vm0, %v2052_v33 }
  0xca   :  { %v1528_v34 = vpop.f32.mrf.mxu0 }
  0xcb   :  { %v229_v40 = vadd.f32 %v1528_v34, %v2059_v35 }
  0xcc   :  { %v223_v36 = vpop.f32.mrf.mxu0 }
  0xcd   :  { %v224_v37 = vadd.f32 %v2059_v35, %v223_v36 }
  0xce   :  { %v1531_v38 = vpop.f32.mrf.mxu0 }
  0xcf   :  { %372 = vxpose.xlu0.b32.start [1/15] (short) (narrow) %v224_v37, 8  ;;  %v239_v46 = vadd.f32 %v1531_v38, %v2059_v35 }
  0xd0   :  { %v233_v39 = vpop.f32.mrf.mxu0 }
  0xd1   :  { %v234_v43 = vadd.f32 %v2059_v35, %v233_v39 }
  0xd2   :  { %v1534_v41 = vpop.f32.mrf.mxu0 }
  0xd3   :  { %373 = vxpose.xlu0.b32.cont [2/15] (short) (narrow) %v229_v40, 8  ;;  %v249_v52 = vadd.f32 %v1534_v41, %v2059_v35 }
  0xd4   :  { %v243_v42 = vpop.f32.mrf.mxu0 }
  0xd5   :  { %v244_v49 = vadd.f32 %v2059_v35, %v243_v42 }
  0xd6   :  { %v1537_v44 = vpop.f32.mrf.mxu0 }
  0xd7   :  { %374 = vxpose.xlu0.b32.cont [3/15] (short) (narrow) %v234_v43, 8  ;;  %v259_v59 = vadd.f32 %v1537_v44, %v2059_v35 }
  0xd8   :  { %v253_v45 = vpop.f32.mrf.mxu0 }
  0xd9   :  { %v254_v55 = vadd.f32 %v2059_v35, %v253_v45 }
  0xda   :  { %v1540_v47 = vpop.f32.mrf.mxu0 }
  0xdb   :  { %375 = vxpose.xlu0.b32.cont [4/15] (short) (narrow) %v239_v46, 8  ;;  %v269_v1 = vadd.f32 %v1540_v47, %v2059_v35 }
  0xdc   :  { %v263_v48 = vpop.f32.mrf.mxu0 }
  0xdd   :  { %v264_v62 = vadd.f32 %v2059_v35, %v263_v48 }
  0xde   :  { %v1543_v50 = vpop.f32.mrf.mxu0 }
  0xdf   :  { %376 = vxpose.xlu0.b32.cont [5/15] (short) (narrow) %v244_v49, 8  ;;  %v279_v38 = vadd.f32 %v1543_v50, %v2059_v35 }
  0xe0   :  { %v273_v51 = vpop.f32.mrf.mxu0 }
  0xe1   :  { %v274_v34 = vadd.f32 %v2059_v35, %v273_v51 }
  0xe2   :  { %v1546_v53 = vpop.f32.mrf.mxu0 }
  0xe3   :  { %377 = vxpose.xlu0.b32.cont [6/15] (short) (narrow) %v249_v52, 8  ;;  %v289_v44 = vadd.f32 %v1546_v53, %v2059_v35 }
  0xe4   :  { %v283_v54 = vpop.f32.mrf.mxu0 }
  0xe5   :  { %v284_v41 = vadd.f32 %v2059_v35, %v283_v54 }
  0xe6   :  { %v1549_v56 = vpop.f32.mrf.mxu0 }
  0xe7   :  { %378 = vxpose.xlu0.b32.cont [7/15] (short) (narrow) %v254_v55, 8  ;;  %v299_v57 = vadd.f32 %v1549_v56, %v2059_v35 }
  0xe8   :  { %v293_v58 = vpop.f32.mrf.mxu0 }
  0xe9   :  { %404 = vxpose.xlu1.b32.start [1/15] (short) (narrow) %v299_v57, 8  ;;  %v294_v47 = vadd.f32 %v2059_v35, %v293_v58 }
  0xea   :  { %v1552_v60 = vpop.f32.mrf.mxu0 }
  0xeb   :  { %379 = vxpose.xlu0.b32.cont [8/15] (short) (narrow) %v259_v59, 8  ;;  %v309_v3 = vadd.f32 %v1552_v60, %v2059_v35 }
  0xec   :  { %v303_v61 = vpop.f32.mrf.mxu0 }
  0xed   :  { %v304_v63 = vadd.f32 %v2059_v35, %v303_v61 }
  0xee   :  { %v1555_v0 = vpop.f32.mrf.mxu0 }
  0xef   :  { %405 = vxpose.xlu1.b32.cont [2/15] (short) (narrow) %v304_v63, 8  ;;  %380 = vxpose.xlu0.b32.cont [9/15] (short) (narrow) %v264_v62, 8  ;;  %v319_v39 = vadd.f32 %v1555_v0, %v2059_v35 }
  0xf0   :  { %v313_v4 = vpop.f32.mrf.mxu0 }
  0xf1   :  { %v314_v36 = vadd.f32 %v2059_v35, %v313_v4 }
  0xf2   :  { %v1558_v37 = vpop.f32.mrf.mxu0 }
  0xf3   :  { %406 = vxpose.xlu1.b32.cont [3/15] (short) (narrow) %v309_v3, 8  ;;  %381 = vxpose.xlu0.b32.cont [10/15] (short) (narrow) %v269_v1, 8  ;;  %v329_v45 = vadd.f32 %v1558_v37, %v2059_v35 }
  0xf4   :  { %v323_v40 = vpop.f32.mrf.mxu0 }
  0xf5   :  { %v324_v42 = vadd.f32 %v2059_v35, %v323_v40 }
  0xf6   :  { %v1561_v43 = vpop.f32.mrf.mxu0 }
  0xf7   :  { %407 = vxpose.xlu1.b32.cont [4/15] (short) (narrow) %v314_v36, 8  ;;  %382 = vxpose.xlu0.b32.cont [11/15] (short) (narrow) %v274_v34, 8  ;;  %v339_v50 = vadd.f32 %v1561_v43, %v2059_v35  ;;  %v436_v34 = vlaneseq }
  0xf8   :  { %v333_v46 = vpop.f32.mrf.mxu0 }
  0xf9   :  { %v334_v48 = vadd.f32 %v2059_v35, %v333_v46 }
  0xfa   :  { %v1564_v49 = vpop.f32.mrf.mxu0 }
  0xfb   :  { %408 = vxpose.xlu1.b32.cont [5/15] (short) (narrow) %v319_v39, 8  ;;  %383 = vxpose.xlu0.b32.cont [12/15] (short) (narrow) %v279_v38, 8  ;;  %v349_v53 = vadd.f32 %v1564_v49, %v2059_v35 }
  0xfc   :  { %v343_v51 = vpop.f32.mrf.mxu0 }
  0xfd   :  { %v344_v52 = vadd.f32 %v2059_v35, %v343_v51 }
  0xfe   :  { %v1567_v54 = vpop.f32.mrf.mxu0 }
  0xff   :  { %409 = vxpose.xlu1.b32.cont [6/15] (short) (narrow) %v324_v42, 8  ;;  %384 = vxpose.xlu0.b32.cont [13/15] (short) (narrow) %v284_v41, 8  ;;  %v359_v58 = vadd.f32 %v1567_v54, %v2059_v35 }
 0x100   :  { %v353_v55 = vpop.f32.mrf.mxu0 }
 0x101   :  { %v354_v56 = vadd.f32 %v2059_v35, %v353_v55 }
 0x102   :  { %v1570_v57 = vpop.f32.mrf.mxu0 }
 0x103   :  { %410 = vxpose.xlu1.b32.cont [7/15] (short) (narrow) %v329_v45, 8  ;;  %385 = vxpose.xlu0.b32.cont [14/15] (short) (narrow) %v289_v44, 8  ;;  %v369_v61 = vadd.f32 %v1570_v57, %v2059_v35 }
 0x104   :  { %v363_v59 = vpop.f32.mrf.mxu0 }
 0x105   :  { %v364_v60 = vadd.f32 %v2059_v35, %v363_v59  ;;  %v2096_v35 = vand.u32 127, %v436_v34 }
 0x107   :  { %411 = vxpose.xlu1.b32.cont [8/15] (short) (narrow) %v334_v48, 8  ;;  %386 = vxpose.xlu0.b32.end [15/15] (short) (narrow) %v294_v47, 8 }
 0x10b   :  { %412 = vxpose.xlu1.b32.cont [9/15] (short) (narrow) %v339_v50, 8 }
 0x10f   :  { %413 = vxpose.xlu1.b32.cont [10/15] (short) (narrow) %v344_v52, 8 }
 0x113   :  { %414 = vxpose.xlu1.b32.cont [11/15] (short) (narrow) %v349_v53, 8 }
 0x117   :  { %415 = vxpose.xlu1.b32.cont [12/15] (short) (narrow) %v354_v56, 8  ;;  %v1798_v56 = vmov 0.0  }
 0x118   :  { %1571 = vmatprep.subr.mxu1 %v1798_v56  ;;  %1601 = vmatprep.mubr.msk.f32.mxu1 %vm1799_vm9, %v1798_v56 }
 0x119   :  { %1572 = vmatpush3.msra.mxu1 %v1945_v18 }
 0x11a   :  { %1573 = vmatprep.subr.mxu1 %v1798_v56 }
 0x11b   :  { %416 = vxpose.xlu1.b32.cont [13/15] (short) (narrow) %v359_v58, 8  ;;  %1574 = vmatpush3.msra.mxu1 %v1940_v17 }
 0x11c   :  { %1575 = vmatprep.subr.mxu1 %v1798_v56 }
 0x11d   :  { %1576 = vmatpush3.msra.mxu1 %v1931_v16 }
 0x11e   :  { %1577 = vmatprep.subr.mxu1 %v1798_v56 }
 0x11f   :  { %417 = vxpose.xlu1.b32.cont [14/15] (short) (narrow) %v364_v60, 8  ;;  %1578 = vmatpush3.msra.mxu1 %v1926_v15 }
 0x120   :  { %1579 = vmatprep.subr.mxu1 %v1798_v56 }
 0x121   :  { %1580 = vmatpush3.msra.mxu1 %v1917_v14 }
 0x122   :  { %1581 = vmatprep.subr.mxu1 %v1798_v56 }
 0x123   :  { %418 = vxpose.xlu1.b32.end [15/15] (short) (narrow) %v369_v61, 8  ;;  %1582 = vmatpush3.msra.mxu1 %v1912_v13 }
 0x124   :  { %1583 = vmatprep.subr.mxu1 %v1798_v56 }
 0x125   :  { %1584 = vmatpush3.msra.mxu1 %v1903_v12 }
 0x126   :  { %1585 = vmatprep.subr.mxu1 %v1798_v56 }
 0x127   :  { %1586 = vmatpush3.msra.mxu1 %v1898_v11 }
 0x128   :  { %1587 = vmatprep.subr.mxu1 %v1798_v56 }
 0x129   :  { %1588 = vmatpush3.msra.mxu1 %v1889_v10 }
 0x12a   :  { %1589 = vmatprep.subr.mxu1 %v1798_v56 }
 0x12b   :  { %1590 = vmatpush3.msra.mxu1 %v1884_v9 }
 0x12c   :  { %1591 = vmatprep.subr.mxu1 %v1798_v56 }
 0x12d   :  { %1592 = vmatpush3.msra.mxu1 %v1875_v8 }
 0x12e   :  { %1593 = vmatprep.subr.mxu1 %v1798_v56 }
 0x12f   :  { %1594 = vmatpush3.msra.mxu1 %v1870_v7 }
 0x130   :  { %1595 = vmatprep.subr.mxu1 %v1798_v56 }
 0x131   :  { %1596 = vmatpush3.msra.mxu1 %v1861_v6 }
 0x132   :  { %1597 = vmatprep.subr.mxu1 %v1798_v56 }
 0x133   :  { %1598 = vmatpush3.msra.mxu1 %v1856_v5 }
 0x134   :  { %1599 = vmatprep.subr.mxu1 %v1798_v56 }
 0x135   :  { %1600 = vmatpush3.msra.mxu1 %v1843_v2 }
 0x136   :  { %1604 = vmatprep.subr.mxu1 %v1798_v56 }
 0x14b   :  { %v388_v62 = vpop.trf.xlu0 }
 0x14c   :  { %v480_v63 = vsel %vm479_vm1, %v388_v62, -inf  ;;  %v439_v0 = vsel %vm438_vm2, %v388_v62, -inf }
 0x14d   :  { %481 = vmax.xlane.f32.xlu0 %v480_v63  ;;  %440 = vmax.xlane.f32.xlu1 %v439_v0 }
 0x167   :  { %v420_v1 = vpop.trf.xlu1 }
 0x168   :  { %v483_v3 = vsel %vm479_vm1, %v420_v1, -inf  ;;  %v442_v4 = vsel %vm438_vm2, %v420_v1, -inf }
 0x169   :  { %484 = vmax.xlane.f32.xlu1 %v483_v3 }
 0x16d   :  { %443 = vmax.xlane.f32.xlu1 %v442_v4 }
 0x1d6   :  { %v482_v36 = vpop.xlane.xlu0 %481  ;;  %v441_v37 = vpop.xlane.xlu1 %440 }
 0x1d7   :  { %vm486_vm3 = vcmp.eq.f32.partialorder %v388_v62, %v482_v36  ;;  %vm445_vm4 = vcmp.eq.f32.partialorder %v388_v62, %v441_v37 }
 0x1d8   :  { %v488_v38 = vsel %vm486_vm3, %v2096_v35, 120  ;;  %v447_v39 = vsel %vm445_vm4, %v2096_v35, 120  ;;  %vm1139_vm3 = vcmask 1041409   ;;  %vm1103_vm4 = vcmask 976896  }
 0x1d9   :  { %v490_v40 = vsel %vm479_vm1, %v488_v38, 2147483647  ;;  %v449_v41 = vsel %vm438_vm2, %v447_v39, 2147483647 }
 0x1da   :  { %v492_v42 = vshra.s32 %v490_v40, 16  ;;  %v451_v43 = vshra.s32 %v449_v41, 16  ;;  %v491_v57 = vand.u32 65535, %v490_v40  ;;  %v450_v58 = vand.u32 65535, %v449_v41  ;;  %v58_v41 = vld [vmem:[%s2453_s3 + $0x18] sm:$0xff] }
 0x1db   :  { %1637 = vmatprep.subr.mxu0 %v58_v41 }
 0x1dc   :  { %v494_v44 = vcvt.s32.f32 %v492_v42  ;;  %v453_v45 = vcvt.s32.f32 %v451_v43  ;;  %v493_v61 = vcvt.s32.f32 %v491_v57  ;;  %v452_v62 = vcvt.s32.f32 %v450_v58  ;;  %v57_v42 = vld [vmem:[%s2453_s3 + $0x10] sm:$0xff]  ;;  %1638 = vmatpush3.msra.mxu0 %v58_v41 }
 0x1dd   :  { %1639 = vmatprep.subr.mxu0 %v57_v42 }
 0x1de   :  { %495 = vmin.xlane.f32.xlu0 %v494_v44  ;;  %454 = vmin.xlane.f32.xlu1 %v453_v45 }
 0x1df   :  { %1640 = vmatpush3.msra.mxu0 %v57_v42 }
 0x1f2   :  { %v485_v46 = vpop.xlane.xlu1 %484 }
 0x1f3   :  { %vm487_vm5 = vcmp.eq.f32.partialorder %v420_v1, %v485_v46 }
 0x1f4   :  { %v489_v47 = vsel %vm487_vm5, %v2096_v35, 120  ;;  %vm1228_vm5 = vcmask 785408  }
 0x1f5   :  { %v505_v48 = vsel %vm479_vm1, %v489_v47, 2147483647 }
 0x1f6   :  { %v444_v49 = vpop.xlane.xlu1 %443  ;;  %v507_v50 = vshra.s32 %v505_v48, 16 }
 0x1f7   :  { %vm446_vm6 = vcmp.eq.f32.partialorder %v420_v1, %v444_v49  ;;  %v506_v1 = vand.u32 65535, %v505_v48 }
 0x1f8   :  { %v448_v51 = vsel %vm446_vm6, %v2096_v35, 120  ;;  %v509_v52 = vcvt.s32.f32 %v507_v50  ;;  %vm1226_vm6 = vcmask 523264  }
 0x1f9   :  { %v464_v54 = vsel %vm438_vm2, %v448_v51, 2147483647  ;;  %v508_v4 = vcvt.s32.f32 %v506_v1 }
 0x1fa   :  { %510 = vmin.xlane.f32.xlu0 %v509_v52  ;;  %v466_v53 = vshra.s32 %v464_v54, 16  ;;  %v465_v36 = vand.u32 65535, %v464_v54 }
 0x1fc   :  { %v468_v55 = vcvt.s32.f32 %v466_v53  ;;  %v467_v39 = vcvt.s32.f32 %v465_v36 }
 0x1fe   :  { %469 = vmin.xlane.f32.xlu1 %v468_v55 }
 0x267   :  { %v496_v59 = vpop.xlane.xlu0 %495  ;;  %v455_v60 = vpop.xlane.xlu1 %454 }
 0x268   :  { %vm497_vm7 = vcmp.eq.f32.partialorder %v494_v44, %v496_v59  ;;  %vm456_vm8 = vcmp.eq.f32.partialorder %v453_v45, %v455_v60  ;;  %v502_v43 = vcvt.f32.s32 %v496_v59  ;;  %v461_v44 = vcvt.f32.s32 %v455_v60 }
 0x269   :  { %v498_v63 = vsel %vm497_vm7, %v493_v61, inf  ;;  %v457_v0 = vsel %vm456_vm8, %v452_v62, inf }
 0x26a   :  { %499 = vmin.xlane.f32.xlu0 %v498_v63  ;;  %458 = vmin.xlane.f32.xlu1 %v457_v0  ;;  %v503_v47 = vshll.u32 %v502_v43, 16  ;;  %v462_v48 = vshll.u32 %v461_v44, 16 }
 0x283   :  { %v511_v3 = vpop.xlane.xlu0 %510 }
 0x284   :  { %vm512_vm10 = vcmp.eq.f32.partialorder %v509_v52, %v511_v3  ;;  %v517_v58 = vcvt.f32.s32 %v511_v3 }
 0x285   :  { %v513_v37 = vsel %vm512_vm10, %v508_v4, inf }
 0x286   :  { %514 = vmin.xlane.f32.xlu0 %v513_v37  ;;  %v518_v60 = vshll.u32 %v517_v58, 16 }
 0x287   :  { %v470_v38 = vpop.xlane.xlu1 %469 }
 0x288   :  { %vm471_vm11 = vcmp.eq.f32.partialorder %v468_v55, %v470_v38  ;;  %v476_v61 = vcvt.f32.s32 %v470_v38 }
 0x289   :  { %v472_v40 = vsel %vm471_vm11, %v467_v39, inf }
 0x28a   :  { %473 = vmin.xlane.f32.xlu1 %v472_v40  ;;  %v477_v1 = vshll.u32 %v476_v61, 16  ;;  %v55_v40 = vld [vmem:[%s2453_s3] sm:$0xff] }
 0x2f3   :  { %v500_v45 = vpop.xlane.xlu0 %499  ;;  %v459_v46 = vpop.xlane.xlu1 %458 }
 0x2f4   :  { %v501_v49 = vcvt.f32.s32 %v500_v45  ;;  %v460_v50 = vcvt.f32.s32 %v459_v46 }
 0x2f6   :  { %v504_v51 = vadd.s32 %v503_v47, %v501_v49  ;;  %v463_v52 = vadd.s32 %v462_v48, %v460_v50 }
 0x2f8   :  { %vm526_vm12 = vcmp.eq.s32.totalorder %v2096_v35, %v504_v51  ;;  %vm520_vm13 = vcmp.eq.s32.totalorder %v2096_v35, %v463_v52 }
 0x2f9   :  { %v1341_v54 = vsel %vm526_vm12, 1.0, %v1798_v56  ;;  %v1339_v55 = vsel %vm520_vm13, 1.0, %v1798_v56 }
 0x2fa   :  { %v534_v53 = vrot.slane %v1341_v54, 4 }
 0x2fc   :  { %v539_v57 = vsel %vm538_vm14, %v1339_v55, %v534_v53 }
 0x2fd   :  { %1602 = vmatmul.mubr.msk.f32.vlgmr.msra.gmra.mxu1 %vm541_vm15, %v539_v57 }
 0x2fe   :  { %1605 = vmatpush3.msra.mxu1 %v2052_v33  ;;  %1634 = vmatprep.mubr.msk.f32.mxu1 %vm1799_vm9, %v1798_v56 }
 0x2ff   :  { %1606 = vmatprep.subr.mxu1 %v1798_v56 }
 0x300   :  { %1607 = vmatpush3.msra.mxu1 %v2043_v32 }
 0x301   :  { %1608 = vmatprep.subr.mxu1 %v1798_v56 }
 0x302   :  { %1609 = vmatpush3.msra.mxu1 %v2038_v31 }
 0x303   :  { %1610 = vmatprep.subr.mxu1 %v1798_v56 }
 0x304   :  { %1611 = vmatpush3.msra.mxu1 %v2029_v30 }
 0x305   :  { %1612 = vmatprep.subr.mxu1 %v1798_v56 }
 0x306   :  { %1613 = vmatpush3.msra.mxu1 %v2024_v29 }
 0x307   :  { %1614 = vmatprep.subr.mxu1 %v1798_v56 }
 0x308   :  { %1615 = vmatpush3.msra.mxu1 %v2015_v28 }
 0x309   :  { %1616 = vmatprep.subr.mxu1 %v1798_v56 }
 0x30a   :  { %1617 = vmatpush3.msra.mxu1 %v2010_v27 }
 0x30b   :  { %1618 = vmatprep.subr.mxu1 %v1798_v56 }
 0x30c   :  { %1619 = vmatpush3.msra.mxu1 %v2001_v26 }
 0x30d   :  { %1620 = vmatprep.subr.mxu1 %v1798_v56 }
 0x30e   :  { %1621 = vmatpush3.msra.mxu1 %v1996_v25 }
 0x30f   :  { %v515_v59 = vpop.xlane.xlu0 %514  ;;  %1622 = vmatprep.subr.mxu1 %v1798_v56 }
 0x310   :  { %v516_v62 = vcvt.f32.s32 %v515_v59  ;;  %1623 = vmatpush3.msra.mxu1 %v1987_v24 }
 0x311   :  { %1624 = vmatprep.subr.mxu1 %v1798_v56 }
 0x312   :  { %v519_v63 = vadd.s32 %v518_v60, %v516_v62  ;;  %1625 = vmatpush3.msra.mxu1 %v1982_v23 }
 0x313   :  { %1626 = vmatprep.subr.mxu1 %v1798_v56  ;;  %v474_v0 = vpop.xlane.xlu1 %473 }
 0x314   :  { %vm527_vm1 = vcmp.eq.s32.totalorder %v2096_v35, %v519_v63  ;;  %v475_v3 = vcvt.f32.s32 %v474_v0  ;;  %1627 = vmatpush3.msra.mxu1 %v1973_v22 }
 0x315   :  { %v1342_v4 = vsel %vm527_vm1, 1.0, %v1798_v56  ;;  %1628 = vmatprep.subr.mxu1 %v1798_v56 }
 0x316   :  { %v478_v36 = vadd.s32 %v477_v1, %v475_v3  ;;  %1629 = vmatpush3.msra.mxu1 %v1968_v21  ;;  %v535_v37 = vrot.slane %v1342_v4, 4 }
 0x317   :  { %1630 = vmatprep.subr.mxu1 %v1798_v56 }
 0x318   :  { %vm521_vm2 = vcmp.eq.s32.totalorder %v2096_v35, %v478_v36  ;;  %1631 = vmatpush3.msra.mxu1 %v1959_v20  ;;  %v56_v35 = vld [vmem:[%s2453_s3 + $0x8] sm:$0xff] }
 0x319   :  { %v1340_v38 = vsel %vm521_vm2, 1.0, %v1798_v56  ;;  %1632 = vmatprep.subr.mxu1 %v1798_v56  ;;  %1641 = vmatprep.subr.mxu0 %v56_v35 }
 0x31a   :  { %1633 = vmatpush3.msra.mxu1 %v1954_v19  ;;  %v540_v39 = vsel %vm538_vm14, %v1340_v38, %v535_v37  ;;  %1642 = vmatpush3.msra.mxu0 %v56_v35  ;;  %v1345_v38 = vld [vmem:[%s2454_s4] ss:$0 sm:$0xff]  ;;  %s1800_s4 = smov 32  }
 0x31b   :  { %1635 = vmatmul.mubr.msk.f32.vlgmr.msra.gmra.mxu1 %vm541_vm15, %v540_v39  ;;  %1648 = vmatprep.subr.mxu1 %v1798_v56 }
 0x31c   :  { %1649 = vmatpush3.xpose.msk.msra.mxu1 %vm66_vm0, %v1945_v18  ;;  %1678 = vmatprep.mubr.msk.f32.mxu1 %vm1799_vm9, %v1798_v56 }
 0x31d   :  { %1650 = vmatprep.subr.mxu1 %v1798_v56  ;;  %1643 = vmatprep.subr.mxu0 %v55_v40 }
 0x31e   :  { %1644 = vmatpush3.msra.mxu0 %v55_v40 }
 0x31f   :  { %1681 = vmatprep.subr.mxu0 %v1798_v56 }
 0x320   :  { %1651 = vmatpush3.xpose.msk.msra.mxu1 %vm66_vm0, %v1940_v17 }
 0x321   :  { %1652 = vmatprep.subr.mxu1 %v1798_v56 }
 0x324   :  { %1653 = vmatpush3.xpose.msk.msra.mxu1 %vm66_vm0, %v1931_v16 }
 0x325   :  { %1654 = vmatprep.subr.mxu1 %v1798_v56 }
 0x328   :  { %1655 = vmatpush3.xpose.msk.msra.mxu1 %vm66_vm0, %v1926_v15 }
 0x329   :  { %1656 = vmatprep.subr.mxu1 %v1798_v56 }
 0x32c   :  { %1657 = vmatpush3.xpose.msk.msra.mxu1 %vm66_vm0, %v1917_v14 }
 0x32d   :  { %1658 = vmatprep.subr.mxu1 %v1798_v56 }
 0x330   :  { %1659 = vmatpush3.xpose.msk.msra.mxu1 %vm66_vm0, %v1912_v13 }
 0x331   :  { %1660 = vmatprep.subr.mxu1 %v1798_v56 }
 0x334   :  { %1661 = vmatpush3.xpose.msk.msra.mxu1 %vm66_vm0, %v1903_v12 }
 0x335   :  { %1662 = vmatprep.subr.mxu1 %v1798_v56 }
 0x338   :  { %1663 = vmatpush3.xpose.msk.msra.mxu1 %vm66_vm0, %v1898_v11 }
 0x339   :  { %1664 = vmatprep.subr.mxu1 %v1798_v56 }
 0x33c   :  { %1665 = vmatpush3.xpose.msk.msra.mxu1 %vm66_vm0, %v1889_v10 }
 0x33d   :  { %1666 = vmatprep.subr.mxu1 %v1798_v56 }
 0x340   :  { %1667 = vmatpush3.xpose.msk.msra.mxu1 %vm66_vm0, %v1884_v9 }
 0x341   :  { %1668 = vmatprep.subr.mxu1 %v1798_v56 }
 0x344   :  { %1669 = vmatpush3.xpose.msk.msra.mxu1 %vm66_vm0, %v1875_v8 }
 0x345   :  { %1670 = vmatprep.subr.mxu1 %v1798_v56 }
 0x348   :  { %1671 = vmatpush3.xpose.msk.msra.mxu1 %vm66_vm0, %v1870_v7 }
 0x349   :  { %1672 = vmatprep.subr.mxu1 %v1798_v56 }
 0x34c   :  { %1673 = vmatpush3.xpose.msk.msra.mxu1 %vm66_vm0, %v1861_v6 }
 0x34d   :  { %1674 = vmatprep.subr.mxu1 %v1798_v56 }
 0x350   :  { %1675 = vmatpush3.xpose.msk.msra.mxu1 %vm66_vm0, %v1856_v5 }
 0x351   :  { %1676 = vmatprep.subr.mxu1 %v1798_v56 }
 0x354   :  { %1677 = vmatpush3.xpose.msk.msra.mxu1 %vm66_vm0, %v1843_v2 }
 0x355   :  { %1714 = vmatprep.subr.mxu1 %v1798_v56 }
 0x3bd   :  { %v611_v41 = vpop.f32.mrf.mxu1 }
 0x3be   :  { %1786 = vtanh.f32 %v611_v41  ;;  %v1186_v44 = vrot.slane %v611_v41, 1  ;;  %v1191_v45 = vrot.slane %v611_v41, 2  ;;  %v1207_v47 = vrot.slane %v611_v41, 5 }
 0x3bf   :  { %v1603_v42 = vpop.f32.mrf.mxu1  ;;  %v1213_v48 = vrot.slane %v611_v41, 6  ;;  %v1203_v49 = vrot.slane %v611_v41, 4  ;;  %v1197_v50 = vrot.slane %v611_v41, 3  ;;  %v1219_v62 = vrot.slane %v611_v41, 7 }
 0x3cb   :  { %v1787_v43 = vpop.eup %1786 }
 0x3cc   :  { %1645 = vmatprep.mubr.msk.f32.mxu0 %vm66_vm0, %v1787_v43 }
 0x3db   :  { %v684_v46 = vpop.f32.mrf.mxu1 }
 0x3dc   :  { %1788 = vtanh.f32 %v684_v46  ;;  %v2245_v51 = vsel %vm1139_vm3, %v684_v46, %v1186_v44  ;;  %v1192_v52 = vrot.slane %v684_v46, 1  ;;  %v1208_v54 = vrot.slane %v684_v46, 4 }
 0x3dd   :  { %v1636_v53 = vpop.f32.mrf.mxu1  ;;  %v1214_v55 = vrot.slane %v684_v46, 5  ;;  %v1183_v57 = vrot.slane %v684_v46, 7  ;;  %v1204_v58 = vrot.slane %v684_v46, 3  ;;  %v1198_v59 = vrot.slane %v684_v46, 2 }
 0x3de   :  { %v2248_v60 = vsel %vm1139_vm3, %v1192_v52, %v1191_v45  ;;  %v2251_v61 = vsel %vm1139_vm3, %v1208_v54, %v1207_v47  ;;  %v1220_v63 = vrot.slane %v684_v46, 6  ;;  %v1802_v53 = vmov 1983009808  }
 0x3df   :  { %v2254_v0 = vsel %vm1139_vm3, %v1214_v55, %v1213_v48  ;;  %v2257_v1 = vsel %vm1139_vm3, %v1183_v57, %v611_v41  ;;  %v2260_v3 = vsel %vm1139_vm3, %v1204_v58, %v1203_v49  ;;  %v2263_v4 = vsel %vm1139_vm3, %v1198_v59, %v1197_v50 }
 0x3e0   :  { %v2266_v36 = vsel %vm1139_vm3, %v1220_v63, %v1219_v62  ;;  %v1269_v55 = vunpack.c.l.s4 %v1802_v53 }
 0x3e9   :  { %v1789_v37 = vpop.eup %1788 }
 0x3ea   :  { %1646 = vmatmul.mubr.msk.f32.vlgmr.msra.gmra.mxu0 %vm66_vm0, %v1789_v37 }
 0x3eb   :  { %1682 = vmatpush3.xpose.msk.msra.mxu0 %vm66_vm0, %v2052_v33  ;;  %1711 = vmatprep.mubr.msk.f32.mxu0 %vm1799_vm9, %v1798_v56 }
 0x3ec   :  { %1683 = vmatprep.subr.mxu0 %v1798_v56 }
 0x3ef   :  { %1684 = vmatpush3.xpose.msk.msra.mxu0 %vm66_vm0, %v2043_v32 }
 0x3f0   :  { %1685 = vmatprep.subr.mxu0 %v1798_v56 }
 0x3f3   :  { %1686 = vmatpush3.xpose.msk.msra.mxu0 %vm66_vm0, %v2038_v31 }
 0x3f4   :  { %1687 = vmatprep.subr.mxu0 %v1798_v56 }
 0x3f7   :  { %1688 = vmatpush3.xpose.msk.msra.mxu0 %vm66_vm0, %v2029_v30 }
 0x3f8   :  { %1689 = vmatprep.subr.mxu0 %v1798_v56 }
 0x3fb   :  { %1690 = vmatpush3.xpose.msk.msra.mxu0 %vm66_vm0, %v2024_v29 }
 0x3fc   :  { %1691 = vmatprep.subr.mxu0 %v1798_v56 }
 0x3ff   :  { %1692 = vmatpush3.xpose.msk.msra.mxu0 %vm66_vm0, %v2015_v28 }
 0x400   :  { %1693 = vmatprep.subr.mxu0 %v1798_v56 }
 0x403   :  { %1694 = vmatpush3.xpose.msk.msra.mxu0 %vm66_vm0, %v2010_v27 }
 0x404   :  { %1695 = vmatprep.subr.mxu0 %v1798_v56 }
 0x407   :  { %1696 = vmatpush3.xpose.msk.msra.mxu0 %vm66_vm0, %v2001_v26 }
 0x408   :  { %1697 = vmatprep.subr.mxu0 %v1798_v56 }
 0x40b   :  { %1698 = vmatpush3.xpose.msk.msra.mxu0 %vm66_vm0, %v1996_v25 }
 0x40c   :  { %1699 = vmatprep.subr.mxu0 %v1798_v56 }
 0x40f   :  { %1700 = vmatpush3.xpose.msk.msra.mxu0 %vm66_vm0, %v1987_v24 }
 0x410   :  { %1701 = vmatprep.subr.mxu0 %v1798_v56 }
 0x413   :  { %1702 = vmatpush3.xpose.msk.msra.mxu0 %vm66_vm0, %v1982_v23 }
 0x414   :  { %1703 = vmatprep.subr.mxu0 %v1798_v56 }
 0x417   :  { %1704 = vmatpush3.xpose.msk.msra.mxu0 %vm66_vm0, %v1973_v22 }
 0x418   :  { %1705 = vmatprep.subr.mxu0 %v1798_v56 }
 0x41b   :  { %1706 = vmatpush3.xpose.msk.msra.mxu0 %vm66_vm0, %v1968_v21 }
 0x41c   :  { %1707 = vmatprep.subr.mxu0 %v1798_v56 }
 0x41f   :  { %1708 = vmatpush3.xpose.msk.msra.mxu0 %vm66_vm0, %v1959_v20 }
 0x420   :  { %1709 = vmatprep.subr.mxu0 %v1798_v56 }
 0x423   :  { %1710 = vmatpush3.xpose.msk.msra.mxu0 %vm66_vm0, %v1954_v19 }
 0x424   :  { %1747 = vmatprep.subr.mxu0 %v1798_v56 }
 0x4aa   :  { %v1647_v39 = vpop.f32.mrf.mxu0 }
 0x4ab   :  { %v2319_v35 = vadd.f32 %v1647_v39, %v1345_v38 }
 0x4ac   :  { %v768_v40 = vpop.f32.mrf.mxu0 }
 0x4ad   :  { %v2321_v41 = vadd.f32 %v1345_v38, %v768_v40  ;;  %1712 = vmatmul.mubr.msk.f32.vlgmr.msra.gmra.mxu0 %vm66_vm0, %v2319_v35  ;;  %v1270_v40 = vunpack.c.0.s8 %v1269_v55 }
 0x4ae   :  { %1748 = vmatpush3.msra.mxu0 %v2052_v33  ;;  %1777 = vmatprep.mubr.msk.f32.mxu0 %vm1799_vm9, %v1798_v56 }
 0x4af   :  { %1679 = vmatmul.mubr.msk.f32.vlgmr.msra.gmra.mxu1 %vm66_vm0, %v2321_v41  ;;  %1749 = vmatprep.subr.mxu0 %v1798_v56 }
 0x4b0   :  { %1715 = vmatpush3.msra.mxu1 %v1945_v18  ;;  %1750 = vmatpush3.msra.mxu0 %v2043_v32 }
 0x4b1   :  { %1716 = vmatprep.subr.mxu1 %v1798_v56  ;;  %1751 = vmatprep.subr.mxu0 %v1798_v56 }
 0x4b2   :  { %1717 = vmatpush3.msra.mxu1 %v1940_v17  ;;  %1752 = vmatpush3.msra.mxu0 %v2038_v31 }
 0x4b3   :  { %1718 = vmatprep.subr.mxu1 %v1798_v56  ;;  %1753 = vmatprep.subr.mxu0 %v1798_v56 }
 0x4b4   :  { %1719 = vmatpush3.msra.mxu1 %v1931_v16  ;;  %1754 = vmatpush3.msra.mxu0 %v2029_v30 }
 0x4b5   :  { %1720 = vmatprep.subr.mxu1 %v1798_v56  ;;  %1755 = vmatprep.subr.mxu0 %v1798_v56 }
 0x4b6   :  { %1721 = vmatpush3.msra.mxu1 %v1926_v15  ;;  %1756 = vmatpush3.msra.mxu0 %v2024_v29 }
 0x4b7   :  { %1722 = vmatprep.subr.mxu1 %v1798_v56  ;;  %1757 = vmatprep.subr.mxu0 %v1798_v56 }
 0x4b8   :  { %1723 = vmatpush3.msra.mxu1 %v1917_v14  ;;  %1758 = vmatpush3.msra.mxu0 %v2015_v28 }
 0x4b9   :  { %1724 = vmatprep.subr.mxu1 %v1798_v56  ;;  %1759 = vmatprep.subr.mxu0 %v1798_v56 }
 0x4ba   :  { %1760 = vmatpush3.msra.mxu0 %v2010_v27  ;;  %1725 = vmatpush3.msra.mxu1 %v1912_v13 }
 0x4bb   :  { %1726 = vmatprep.subr.mxu1 %v1798_v56  ;;  %1761 = vmatprep.subr.mxu0 %v1798_v56 }
 0x4bc   :  { %1727 = vmatpush3.msra.mxu1 %v1903_v12  ;;  %1762 = vmatpush3.msra.mxu0 %v2001_v26 }
 0x4bd   :  { %1728 = vmatprep.subr.mxu1 %v1798_v56  ;;  %1763 = vmatprep.subr.mxu0 %v1798_v56 }
 0x4be   :  { %1764 = vmatpush3.msra.mxu0 %v1996_v25  ;;  %1729 = vmatpush3.msra.mxu1 %v1898_v11 }
 0x4bf   :  { %1730 = vmatprep.subr.mxu1 %v1798_v56  ;;  %1765 = vmatprep.subr.mxu0 %v1798_v56 }
 0x4c0   :  { %1731 = vmatpush3.msra.mxu1 %v1889_v10  ;;  %1766 = vmatpush3.msra.mxu0 %v1987_v24 }
 0x4c1   :  { %1732 = vmatprep.subr.mxu1 %v1798_v56  ;;  %1767 = vmatprep.subr.mxu0 %v1798_v56 }
 0x4c2   :  { %1768 = vmatpush3.msra.mxu0 %v1982_v23  ;;  %1733 = vmatpush3.msra.mxu1 %v1884_v9 }
 0x4c3   :  { %1734 = vmatprep.subr.mxu1 %v1798_v56  ;;  %1769 = vmatprep.subr.mxu0 %v1798_v56 }
 0x4c4   :  { %1735 = vmatpush3.msra.mxu1 %v1875_v8  ;;  %1770 = vmatpush3.msra.mxu0 %v1973_v22 }
 0x4c5   :  { %1736 = vmatprep.subr.mxu1 %v1798_v56  ;;  %1771 = vmatprep.subr.mxu0 %v1798_v56 }
 0x4c6   :  { %1737 = vmatpush3.msra.mxu1 %v1870_v7  ;;  %1772 = vmatpush3.msra.mxu0 %v1968_v21 }
 0x4c7   :  { %1738 = vmatprep.subr.mxu1 %v1798_v56  ;;  %1773 = vmatprep.subr.mxu0 %v1798_v56 }
 0x4c8   :  { %1739 = vmatpush3.msra.mxu1 %v1861_v6  ;;  %1774 = vmatpush3.msra.mxu0 %v1959_v20 }
 0x4c9   :  { %1740 = vmatprep.subr.mxu1 %v1798_v56  ;;  %1775 = vmatprep.subr.mxu0 %v1798_v56 }
 0x4ca   :  { %1741 = vmatpush3.msra.mxu1 %v1856_v5  ;;  %1776 = vmatpush3.msra.mxu0 %v1954_v19 }
 0x4cb   :  { %1742 = vmatprep.subr.mxu1 %v1798_v56  ;;  %1744 = vmatprep.mubr.msk.f32.mxu1 %vm1799_vm9, %v1798_v56 }
 0x4cc   :  { %1743 = vmatpush3.msra.mxu1 %v1843_v2 }
 0x56d   :  { %v919_v7 = vpop.f32.mrf.mxu0 }
 0x56e   :  { %v924_v8 = vmul.f32 0.17677669, %v919_v7  ;;  %v1272_v7 = vshrl.u32 %v436_v34, 7 }
 0x56f   :  { %v846_v6 = vpop.f32.mrf.mxu1  ;;  %v1713_v9 = vpop.f32.mrf.mxu0 }
 0x570   :  { %v923_v10 = vmul.f32 0.17677669, %v846_v6  ;;  %v928_v11 = vsel %vm541_vm15, %v924_v8, -inf }
 0x571   :  { %929 = vmax.xlane.f32.xlu1 %v928_v11  ;;  %v1680_v12 = vpop.f32.mrf.mxu1 }
 0x572   :  { %v925_v5 = vsel %vm541_vm15, %v923_v10, -inf }
 0x573   :  { %926 = vmax.xlane.f32.xlu0 %v925_v5 }
 0x5fa   :  { %v930_v13 = vpop.xlane.xlu1 %929 }
 0x5fb   :  { %v932_v14 = vsub.f32 %v924_v8, %v930_v13 }
 0x5fc   :  { %v927_v15 = vpop.xlane.xlu0 %926 }
 0x5fd   :  { %v935_v16 = vmul.f32 1.442695, %v932_v14  ;;  %v931_v17 = vsub.f32 %v923_v10, %v927_v15  ;;  %v2408_v15 = vsub.s32 %v1270_v40, %v1272_v7 }
 0x5ff   :  { %1790 = vpow2.f32 %v935_v16  ;;  %v933_v18 = vmul.f32 1.442695, %v931_v17 }
 0x601   :  { %1792 = vpow2.f32 %v933_v18 }
 0x60c   :  { %v1791_v2 = vpop.eup %1790 }
 0x60d   :  { %v940_v19 = vsel %vm541_vm15, %v1791_v2, 0.0 }
 0x60e   :  { %v1793_v20 = vpop.eup %1792  ;;  %941 = vadd.xlane.f32.xlu1 %v940_v19 }
 0x60f   :  { %v937_v21 = vsel %vm541_vm15, %v1793_v20, 0.0 }
 0x610   :  { %938 = vadd.xlane.f32.xlu0 %v937_v21 }
 0x61f   :  { %1188 = vrot.lane.b32.xlu1 %v2245_v51, %s1800_s4 }
 0x623   :  { %1194 = vrot.lane.b32.xlu1 %v2248_v60, %s1801_s17 }
 0x626   :  { %1210 = vrot.lane.b32.xlu0 %v2251_v61, %s1800_s4 }
 0x62a   :  { %1216 = vrot.lane.b32.xlu0 %v2254_v0, %s1801_s17 }
 0x697   :  { %v942_v22 = vpop.xlane.xlu1 %941 }
 0x698   :  { %1794 = vrcp.f32 %v942_v22 }
 0x699   :  { %v939_v23 = vpop.xlane.xlu0 %938 }
 0x69a   :  { %1796 = vrcp.f32 %v939_v23 }
 0x6a5   :  { %v1795_v24 = vpop.eup %1794 }
 0x6a6   :  { %v946_v25 = vmul.f32 %v1795_v24, %v1791_v2  ;;  %v1096_v24 = vmul.f32 0.1, %v2319_v35 }
 0x6a7   :  { %v1797_v26 = vpop.eup %1796 }
 0x6a8   :  { %1778 = vmatmul.mubr.msk.f32.vlgmr.msra.gmra.mxu0 %vm541_vm15, %v946_v25  ;;  %v1100_v27 = vrot.slane %v946_v25, 1  ;;  %v1119_v28 = vrot.slane %v946_v25, 5  ;;  %v945_v29 = vmul.f32 %v1797_v26, %v1793_v20  ;;  %v1239_v57 = vrot.slane %v946_v25, 7 }
 0x6a9   :  { %v1243_v58 = vrot.slane %v946_v25, 3 }
 0x6aa   :  { %v1111_v30 = vsel %vm1103_vm4, %v1100_v27, 0.0  ;;  %v1129_v31 = vsel %vm1103_vm4, %v1119_v28, 0.0  ;;  %1745 = vmatmul.mubr.msk.f32.vlgmr.msra.gmra.mxu1 %vm541_vm15, %v945_v29  ;;  %v1099_v32 = vrot.slane %v945_v29, 1  ;;  %v1118_v33 = vrot.slane %v945_v29, 5 }
 0x6ab   :  { %v1112_v56 = vrot.slane %v1111_v30, 4  ;;  %v1130_v42 = vrot.slane %v1129_v31, 4  ;;  %v1242_v49 = vrot.slane %v945_v29, 4  ;;  %v1240_v9 = vsel %vm1139_vm3, %v1239_v57, %v945_v29 }
 0x6ac   :  { %v1104_v43 = vsel %vm1103_vm4, %v1099_v32, 0.0  ;;  %v1122_v44 = vsel %vm1103_vm4, %v1118_v33, 0.0  ;;  %v1254_v14 = vsel %vm541_vm15, %v1240_v9, 0.0  ;;  %v1095_v28 = vmul.f32 0.1, %v2321_v41 }
 0x6ad   :  { %v1105_v45 = vrot.slane %v1104_v43, 4  ;;  %v1123_v46 = vrot.slane %v1122_v44, 4  ;;  %v1113_v47 = vadd.f32 %v1112_v56, %v1111_v30  ;;  %v1131_v48 = vadd.f32 %v1130_v42, %v1129_v31 }
 0x6ae   :  { %v1244_v63 = vsel %vm1139_vm3, %v1243_v58, %v1242_v49 }
 0x6af   :  { %v1106_v50 = vadd.f32 %v1105_v45, %v1104_v43  ;;  %v1114_v51 = vrot.slane %v1113_v47, 2  ;;  %v1124_v52 = vadd.f32 %v1123_v46, %v1122_v44  ;;  %v1132_v54 = vrot.slane %v1131_v48, 2 }
 0x6b0   :  { %v1255_v10 = vsel %vm541_vm15, %v1244_v63, 0.0 }
 0x6b1   :  { %v1107_v59 = vrot.slane %v1106_v50, 2  ;;  %v1115_v60 = vadd.f32 %v1114_v51, %v1113_v47  ;;  %v1125_v61 = vrot.slane %v1124_v52, 2  ;;  %v1133_v62 = vadd.f32 %v1132_v54, %v1131_v48 }
 0x6b2   :  { %v1283_v18 = vcombine.low %v1254_v14, %v1255_v10 }
 0x6b3   :  { %v1108_v0 = vadd.f32 %v1107_v59, %v1106_v50  ;;  %v1116_v37 = vrot.slane %v1115_v60, 1  ;;  %v1126_v38 = vadd.f32 %v1125_v61, %v1124_v52  ;;  %v1134_v39 = vrot.slane %v1133_v62, 1  ;;  %v1189_v61 = vpop.permute.xlu1 %1188 }
 0x6b4   :  { %v1291_v20 = vrot.slane %v1283_v18, %v2408_v15 }
 0x6b5   :  { %v1109_v8 = vrot.slane %v1108_v0, 1  ;;  %v1127_v6 = vrot.slane %v1126_v38, 1  ;;  %v1117_v12 = vadd.f32 %v1116_v37, %v1115_v60  ;;  %v1135_v13 = vadd.f32 %v1134_v39, %v1133_v62  ;;  %v1211_v62 = vpop.permute.xlu0 %1210 }
 0x6b7   :  { %v1110_v11 = vadd.f32 %v1109_v8, %v1108_v0  ;;  %v1128_v5 = vadd.f32 %v1127_v6, %v1126_v38  ;;  %v1195_v63 = vpop.permute.xlu1 %1194 }
 0x6b9   :  { %v1248_v16 = vsel %vm1139_vm3, %v1117_v12, %v1110_v11  ;;  %v1252_v17 = vsel %vm1139_vm3, %v1135_v13, %v1128_v5  ;;  %v1217_v0 = vpop.permute.xlu0 %1216  ;;  %v1233_v5 = vsel %vm66_vm0, %v2257_v1, %v1189_v61  ;;  %v1236_v13 = vsel %vm66_vm0, %v2260_v3, %v1211_v62 }
 0x6ba   :  { %v1256_v34 = vsel %vm541_vm15, %v1248_v16, 0.0  ;;  %v1257_v2 = vsel %vm541_vm15, %v1252_v17, 0.0  ;;  %v1234_v14 = vsel %vm1226_vm6, %v1233_v5, %v1195_v63  ;;  %v1237_v16 = vsel %vm1226_vm6, %v1236_v13, %v1217_v0 }
 0x6bb   :  { %v1284_v19 = vcombine.low %v1256_v34, %v1257_v2 }
 0x6bd   :  { %v1298_v21 = vrot.slane %v1284_v19, %v2408_v15 }
 0x6bf   :  { %v1299_v22 = vcombine.low %v1291_v20, %v1298_v21 }
 0x6c1   :  { %1303 = vst [vmem:[%s2455_s5 + $0x8] sm:$0xff] %v1299_v22 }
 0x768   :  { %v1089_v23 = vpop.f32.mrf.mxu0 }
 0x769   :  { %v1094_v25 = vmul.f32 0.9, %v1089_v23 }
 0x76a   :  { %v1016_v26 = vpop.f32.mrf.mxu1  ;;  %v1779_v27 = vpop.f32.mrf.mxu0 }
 0x76b   :  { %v1098_v29 = vadd.f32 %v1096_v24, %v1094_v25  ;;  %v1093_v30 = vmul.f32 0.9, %v1016_v26 }
 0x76c   :  { %v1746_v31 = vpop.f32.mrf.mxu1 }
 0x76d   :  { %v1097_v32 = vadd.f32 %v1095_v28, %v1093_v30  ;;  %v1164_v33 = vrot.slane %v1098_v29, 4  ;;  %v1148_v56 = vrot.slane %v1098_v29, 1  ;;  %v1170_v42 = vrot.slane %v1098_v29, 5 }
 0x76e   :  { %v1154_v43 = vrot.slane %v1098_v29, 2  ;;  %v1176_v44 = vrot.slane %v1098_v29, 6  ;;  %v1160_v45 = vrot.slane %v1098_v29, 3  ;;  %v1138_v46 = vrot.slane %v1098_v29, 7 }
 0x76f   :  { %v1163_v47 = vrot.slane %v1097_v32, 5  ;;  %v1142_v48 = vrot.slane %v1097_v32, 1  ;;  %v1147_v49 = vrot.slane %v1097_v32, 2  ;;  %v1169_v35 = vrot.slane %v1097_v32, 6 }
 0x770   :  { %v1153_v50 = vrot.slane %v1097_v32, 3  ;;  %v1175_v51 = vrot.slane %v1097_v32, 7  ;;  %v1159_v52 = vrot.slane %v1097_v32, 4  ;;  %v1140_v41 = vsel %vm1139_vm3, %v1138_v46, %v1097_v32 }
 0x771   :  { %v1165_v54 = vsel %vm1139_vm3, %v1164_v33, %v1163_v47  ;;  %v1143_v53 = vsel %vm1139_vm3, %v1098_v29, %v1142_v48  ;;  %v1149_v55 = vsel %vm1139_vm3, %v1148_v56, %v1147_v49  ;;  %v1171_v57 = vsel %vm1139_vm3, %v1170_v42, %v1169_v35 }
 0x772   :  { %1166 = vrot.lane.b32.xlu1 %v1165_v54, %s1800_s4  ;;  %1144 = vrot.lane.b32.xlu0 %v1143_v53, %s1800_s4  ;;  %v1155_v58 = vsel %vm1139_vm3, %v1154_v43, %v1153_v50  ;;  %v1177_v59 = vsel %vm1139_vm3, %v1176_v44, %v1175_v51  ;;  %v1161_v60 = vsel %vm1139_vm3, %v1160_v45, %v1159_v52 }
 0x776   :  { %1150 = vrot.lane.b32.xlu1 %v1149_v55, %s1801_s17  ;;  %1172 = vrot.lane.b32.xlu0 %v1171_v57, %s1801_s17 }
 0x77a   :  { %1156 = vrot.lane.b32.xlu1 %v1155_v58, %s1803_s20  ;;  %1178 = vrot.lane.b32.xlu0 %v1177_v59, %s1803_s20 }
 0x77e   :  { %1200 = vrot.lane.b32.xlu1 %v2263_v4, %s1803_s20  ;;  %1222 = vrot.lane.b32.xlu0 %v2266_v36, %s1803_s20 }
 0x7e4   :  { %v1167_v37 = vpop.permute.xlu1 %1166  ;;  %v1145_v38 = vpop.permute.xlu0 %1144 }
 0x7e5   :  { %v1230_v7 = vsel %vm66_vm0, %v1161_v60, %v1167_v37  ;;  %v1225_v8 = vsel %vm66_vm0, %v1140_v41, %v1145_v38 }
 0x7e8   :  { %v1151_v39 = vpop.permute.xlu1 %1150  ;;  %v1173_v40 = vpop.permute.xlu0 %1172 }
 0x7e9   :  { %v1227_v6 = vsel %vm1226_vm6, %v1225_v8, %v1151_v39  ;;  %v1231_v9 = vsel %vm1226_vm6, %v1230_v7, %v1173_v40 }
 0x7ec   :  { %v1157_v10 = vpop.permute.xlu1 %1156  ;;  %v1179_v4 = vpop.permute.xlu0 %1178 }
 0x7ed   :  { %v1229_v36 = vsel %vm1228_vm5, %v1227_v6, %v1157_v10  ;;  %v1232_v11 = vsel %vm1228_vm5, %v1231_v9, %v1179_v4 }
 0x7ee   :  { %v1266_v12 = vcombine.low %v1229_v36, %v1232_v11 }
 0x7f0   :  { %v1201_v17 = vpop.permute.xlu1 %1200  ;;  %v1223_v18 = vpop.permute.xlu0 %1222  ;;  %v1274_v20 = vrot.slane %v1266_v12, %v2408_v15 }
 0x7f1   :  { %v1235_v34 = vsel %vm1228_vm5, %v1234_v14, %v1201_v17  ;;  %v1238_v2 = vsel %vm1228_vm5, %v1237_v16, %v1223_v18 }
 0x7f2   :  { %v1267_v19 = vcombine.low %v1235_v34, %v1238_v2 }
 0x7f4   :  { %v1281_v21 = vrot.slane %v1267_v19, %v2408_v15 }
 0x7f6   :  { %v1282_v22 = vcombine.low %v1274_v20, %v1281_v21 }
 0x7f8   :  { %1302 = vst [vmem:[%s2455_s5] sm:$0xff] %v1282_v22 }

</bundles_post_ra>
